<compile_context>
chip_gen: v7x
topology: tpu7x:2x2x1
jax: 0.10.0
libtpu: 0.0.40
codegen_flags: <defaults>
</compile_context>

<pallas_src>
from functools import partial

import jax
import jax.numpy as jnp
from jax import lax
from jax.experimental import pallas as pl
from jax.experimental.pallas import tpu as pltpu


_LANE_CHUNK = 2048    # lane chunk for the in-kernel reduction (multiple of 512)
_MONO_MAX_S = 8192    # up to this many lanes, reduce/apply in one full-width shot


def _vmem_budget():
    """Usable scoped-VMEM budget, generation aware (v5e/v6e: 128 MiB, v7x: 64 MiB)."""
    try:
        cap = int(pltpu.get_tpu_info().vmem_capacity_bytes)
    except Exception:
        cap = 64 << 20          # unknown -> assume the smallest (v7x-sized) VMEM
    return max(24 << 20, (cap * 3) // 4)


# ---------------------------------------------------------------------------
# Single-pass kernel: one (row_tile, S) block per grid step (1 read + 1 write).
# ---------------------------------------------------------------------------
def _grn_kernel(x_ref, g_ref, b_ref, o_ref, *, eps):
    row_tile, S = x_ref.shape
    g = g_ref[...].astype(jnp.float32)           # (row_tile, 1), tiled per step
    b = b_ref[...].astype(jnp.float32)
    inv_eps = jnp.float32(1.0 / eps)

    if S <= _MONO_MAX_S:
        # Small/medium S: single full-width pass.
        x = x_ref[...].astype(jnp.float32)
        norm = jnp.sqrt(jnp.sum(x * x, axis=-1, keepdims=True))   # (row_tile, 1)
        feat = jnp.minimum(norm * inv_eps, 1.0)   # == n / max(n, eps)  (n >= 0)
        scale = feat * g + 1.0                    # fold the residual "+ x"
        o_ref[...] = (x * scale + b).astype(o_ref.dtype)
    else:
        # Large S: chunk the lane axis to bound live ranges; bounded unroll.
        num_full = S // _LANE_CHUNK
        rem = S - num_full * _LANE_CHUNK          # static tail (S need not divide)
        unroll = min(num_full, 4)

        def _acc(c, acc):
            start = pl.multiple_of(c * _LANE_CHUNK, _LANE_CHUNK)
            xc = x_ref[:, pl.ds(start, _LANE_CHUNK)].astype(jnp.float32)
            return acc + jnp.sum(xc * xc, axis=-1, keepdims=True)

        sumsq = lax.fori_loop(0, num_full, _acc, jnp.zeros_like(g), unroll=unroll)
        if rem:
            xt = x_ref[:, pl.ds(num_full * _LANE_CHUNK, rem)].astype(jnp.float32)
            sumsq = sumsq + jnp.sum(xt * xt, axis=-1, keepdims=True)

        norm = jnp.sqrt(sumsq)
        feat = jnp.minimum(norm * inv_eps, 1.0)
        scale = feat * g + 1.0

        # Hoist lane broadcasts out of the write loop (JAX does not CSE
        # broadcast_in_dim) when the footprint is small; otherwise keep the
        # cheap implicit per-chunk sublane broadcast.
        if row_tile * _LANE_CHUNK <= 16384:
            scale_w = jnp.broadcast_to(scale, (row_tile, _LANE_CHUNK))
            b_w = jnp.broadcast_to(b, (row_tile, _LANE_CHUNK))
        else:
            scale_w, b_w = scale, b

        def _write(c, carry):
            start = pl.multiple_of(c * _LANE_CHUNK, _LANE_CHUNK)
            xc = x_ref[:, pl.ds(start, _LANE_CHUNK)].astype(jnp.float32)
            o_ref[:, pl.ds(start, _LANE_CHUNK)] = (xc * scale_w + b_w).astype(o_ref.dtype)
            return carry

        lax.fori_loop(0, num_full, _write, 0, unroll=unroll)
        if rem:
            xt = x_ref[:, pl.ds(num_full * _LANE_CHUNK, rem)].astype(jnp.float32)
            o_ref[:, pl.ds(num_full * _LANE_CHUNK, rem)] = (xt * scale + b).astype(o_ref.dtype)


def _pick_row_tile(rows, S, itemsize, budget):
    """Large blocks to amortize per-step overhead, but >= 4 grid steps when
    possible (2 TCs on v7x x double-buffering); multiple of 8 sublanes
    (or == rows when rows < 8, which satisfies the full-dim exception)."""
    if rows <= 8:
        return rows
    target = max(1 << 20, min(8 << 20, budget // 8))
    rt = (target // max(1, S * itemsize)) // 8 * 8
    rt = max(8, min(rt, (rows // 8) * 8))
    if rows >= 32:
        rt = min(rt, max(8, (rows // 4) // 8 * 8))   # >= 4 grid steps
    elif rows >= 16:
        rt = 8                                       # 2-3 steps, best available
    return rt


def _grn_single_pass(x2d, g_rows, b_rows, eps, budget):
    rows, S = x2d.shape
    itemsize = jnp.dtype(x2d.dtype).itemsize
    row_tile = _pick_row_tile(rows, S, itemsize, budget)
    grid = (pl.cdiv(rows, row_tile),)            # no host-side padding of x

    cost = pl.CostEstimate(
        flops=5 * rows * S,
        transcendentals=rows,
        bytes_accessed=2 * rows * S * itemsize + 3 * rows * 4,
    )

    return pl.pallas_call(
        partial(_grn_kernel, eps=float(eps)),
        out_shape=jax.ShapeDtypeStruct((rows, S), x2d.dtype),
        grid_spec=pltpu.PrefetchScalarGridSpec(
            num_scalar_prefetch=0,
            grid=grid,
            in_specs=[
                # NOTE: pipeline_mode=pl.Buffered(3) on x is a possible small win
                # for this pure-DMA kernel; left at default double-buffering.
                pl.BlockSpec((row_tile, S), lambda i: (i, 0)),
                pl.BlockSpec((row_tile, 1), lambda i: (i, 0)),   # per-tile gamma
                pl.BlockSpec((row_tile, 1), lambda i: (i, 0)),   # per-tile bias
            ],
            out_specs=pl.BlockSpec((row_tile, S), lambda i: (i, 0)),
        ),
        compiler_params=pltpu.CompilerParams(
            dimension_semantics=("parallel",),
            vmem_limit_bytes=int(budget),
        ),
        cost_estimate=cost,
    )(x2d, g_rows, b_rows)


# ---------------------------------------------------------------------------
# Two-pass fallback for huge S (split-S grid; bounded VMEM, 3x HBM traffic).
# ---------------------------------------------------------------------------
def _grn_sumsq_kernel(x_ref, g_ref, scale_ref, *, eps, total_s, s_tile):
    j = pl.program_id(1)

    @pl.when(j == 0)
    def _():
        scale_ref[...] = jnp.zeros_like(scale_ref)

    x = x_ref[...].astype(jnp.float32)
    if total_s % s_tile:
        # Ragged last lane-block: mask lanes past the true row length so
        # out-of-bounds garbage cannot pollute the sum of squares.
        lane = lax.broadcasted_iota(jnp.int32, x.shape, 1) + j * s_tile
        x = jnp.where(lane < total_s, x, 0.0)
    scale_ref[...] += jnp.sum(x * x, axis=-1, keepdims=True)

    @pl.when(j == pl.num_programs(1) - 1)
    def _():
        norm = jnp.sqrt(scale_ref[...])
        feat = jnp.minimum(norm * jnp.float32(1.0 / eps), 1.0)
        scale_ref[...] = feat * g_ref[...].astype(jnp.float32) + 1.0


def _grn_apply_kernel(x_ref, scale_ref, b_ref, o_ref):
    x = x_ref[...].astype(jnp.float32)
    o_ref[...] = (x * scale_ref[...] + b_ref[...]).astype(o_ref.dtype)


def _grn_two_pass(x2d, g_rows, b_rows, eps, budget):
    rows, S = x2d.shape
    itemsize = jnp.dtype(x2d.dtype).itemsize

    if rows < 8:
        row_tile = rows
    else:
        row_tile = min((rows // 8) * 8, 64)
        if rows >= 16:
            row_tile = min(row_tile, max(8, (rows // 2) // 8 * 8))  # >= 2 row blocks

    if S <= 1024:
        s_tile = S
    else:
        target = max(1 << 20, min(4 << 20, budget // 12))
        s_tile = (target // max(1, row_tile * itemsize)) // 512 * 512
        s_tile = max(512, min(s_tile, 1 << 16))

    grid = (pl.cdiv(rows, row_tile), pl.cdiv(S, s_tile))

    # Pass 1: per-row scale = feat*gamma + 1 (accumulate sumsq in the resident
    # (row_tile, 1) output block across the "arbitrary" lane axis).
    scale = pl.pallas_call(
        partial(_grn_sumsq_kernel, eps=float(eps), total_s=S, s_tile=s_tile),
        out_shape=jax.ShapeDtypeStruct((rows, 1), jnp.float32),
        grid_spec=pltpu.PrefetchScalarGridSpec(
            num_scalar_prefetch=0,
            grid=grid,
            in_specs=[
                pl.BlockSpec((row_tile, s_tile), lambda i, j: (i, j)),
                pl.BlockSpec((row_tile, 1), lambda i, j: (i, 0)),
            ],
            out_specs=pl.BlockSpec((row_tile, 1), lambda i, j: (i, 0)),
        ),
        compiler_params=pltpu.CompilerParams(
            dimension_semantics=("parallel", "arbitrary"),
            vmem_limit_bytes=int(budget),
        ),
    )(x2d, g_rows)

    # Pass 2: out = x * scale + bias (fully parallel elementwise apply).
    return pl.pallas_call(
        _grn_apply_kernel,
        out_shape=jax.ShapeDtypeStruct((rows, S), x2d.dtype),
        grid_spec=pltpu.PrefetchScalarGridSpec(
            num_scalar_prefetch=0,
            grid=grid,
            in_specs=[
                pl.BlockSpec((row_tile, s_tile), lambda i, j: (i, j)),
                pl.BlockSpec((row_tile, 1), lambda i, j: (i, 0)),
                pl.BlockSpec((row_tile, 1), lambda i, j: (i, 0)),
            ],
            out_specs=pl.BlockSpec((row_tile, s_tile), lambda i, j: (i, j)),
        ),
        compiler_params=pltpu.CompilerParams(
            dimension_semantics=("parallel", "parallel"),
            vmem_limit_bytes=int(budget),
        ),
    )(x2d, scale, b_rows)


# ---------------------------------------------------------------------------
# Public wrapper.
# ---------------------------------------------------------------------------
def grn_forward(x, gamma, bias, eps=1e-05):
    """x: (B, C, D, H, W); gamma, bias: (C, 1, 1, 1)."""
    B, C, D, H, W = x.shape
    S = D * H * W
    rows = B * C
    itemsize = jnp.dtype(x.dtype).itemsize

    # rows on sublanes, flattened spatial on lanes (reshape is free in XLA);
    # per-channel params become per-row scalars (tiny host-side broadcast).
    x2d = x.reshape(rows, S)
    g_rows = jnp.broadcast_to(gamma.reshape(1, C), (B, C)).reshape(rows, 1).astype(jnp.float32)
    b_rows = jnp.broadcast_to(bias.reshape(1, C), (B, C)).reshape(rows, 1).astype(jnp.float32)

    budget = _vmem_budget()

    # Smallest single-pass footprint: (min_rt, S) in+out, double-buffered,
    # plus an f32 upcast temp for 16-bit inputs.
    # TODO(synk): for bf16 inputs on v6e/v7x the apply could stay in bf16 (f32
    # accumulation only) to halve vreg pressure; kept f32 for exactness.
    min_rt = rows if rows < 8 else 8
    f32_tmp = min_rt * S * 4 if x.dtype != jnp.float32 else 0
    min_single = 4 * min_rt * S * itemsize + 2 * f32_tmp + (1 << 20)

    if min_single <= budget:
        out2d = _grn_single_pass(x2d, g_rows, b_rows, eps, budget)
    else:
        out2d = _grn_two_pass(x2d, g_rows, b_rows, eps, budget)
    return out2d.reshape(B, C, D, H, W)


def grn_reference(x, gamma, bias, eps=1e-05):
    # Pure-JAX reference mirroring the PyTorch code exactly.
    n = jnp.sqrt(jnp.sum(x * x, axis=(2, 3, 4), keepdims=True))      # (B,C,1,1,1)
    denom = jnp.maximum(jnp.mean(n, axis=-1, keepdims=True), eps)    # .clamp(min=eps)
    feat = n / denom
    g = gamma.reshape(1, gamma.shape[0], 1, 1, 1)
    b = bias.reshape(1, bias.shape[0], 1, 1, 1)
    return x * feat * g + b + x


if __name__ == "__main__":
    key = jax.random.PRNGKey(0)
    kx, kg, kb, kx2 = jax.random.split(key, 4)

    # --- Test 1: small NCDHW input, monolithic single-pass path ---
    B, C, D, H, W = 2, 4, 4, 8, 8            # rows=8, S=256
    x = jax.random.normal(kx, (B, C, D, H, W), dtype=jnp.float32)
    # Shrink one (batch, channel) slice so its L2 norm drops below eps and the
    # feat = n/eps < 1 branch is actually exercised.
    x = x.at[0, 0].multiply(1e-8)
    gamma = 0.1 * jax.random.normal(kg, (C, 1, 1, 1), dtype=jnp.float32)
    bias = 0.1 * jax.random.normal(kb, (C, 1, 1, 1), dtype=jnp.float32)

    out = jax.block_until_ready(grn_forward(x, gamma, bias))
    ref = grn_reference(x, gamma, bias)
    assert out.shape == ref.shape == (B, C, D, H, W)
    assert jnp.allclose(out, ref, atol=1e-5, rtol=1e-5), "single-pass mismatch"

    # --- Test 2: exercise the two-pass (split-S) fallback on the same data ---
    rows, S = B * C, D * H * W
    x2d = x.reshape(rows, S)
    g_rows = jnp.broadcast_to(gamma.reshape(1, C), (B, C)).reshape(rows, 1).astype(jnp.float32)
    b_rows = jnp.broadcast_to(bias.reshape(1, C), (B, C)).reshape(rows, 1).astype(jnp.float32)
    out_tp = jax.block_until_ready(_grn_two_pass(x2d, g_rows, b_rows, 1e-5, _vmem_budget()))
    assert jnp.allclose(out_tp.reshape(B, C, D, H, W), ref, atol=1e-5, rtol=1e-5), \
        "two-pass mismatch"

    # --- Test 3: lane-chunked single-pass path (S > 8192, non-divisible tail) ---
    B2, C2, D2, H2, W2 = 1, 8, 3, 48, 64     # rows=8, S=9216 -> 4 full chunks + 1024 tail
    x2 = jax.random.normal(kx2, (B2, C2, D2, H2, W2), dtype=jnp.float32)
    gamma2 = 0.1 * jax.random.normal(kg, (C2, 1, 1, 1), dtype=jnp.float32)
    bias2 = 0.1 * jax.random.normal(kb, (C2, 1, 1, 1), dtype=jnp.float32)
    out2 = jax.block_until_ready(grn_forward(x2, gamma2, bias2))
    ref2 = grn_reference(x2, gamma2, bias2)
    assert jnp.allclose(out2, ref2, atol=1e-4, rtol=1e-5), "chunked-path mismatch"

    print("KERNEL_OK")
</pallas_src>

<mosaic_0001>
module attributes {stable_mosaic.version = 11 : i64} {
  func.func @_grn_kernel(%arg0: i32, %arg1: memref<8x256xf32, #tpu.memory_space<vmem>>, %arg2: memref<8x1xf32, #tpu.memory_space<vmem>>, %arg3: memref<8x1xf32, #tpu.memory_space<vmem>>, %arg4: memref<8x256xf32, #tpu.memory_space<vmem>>) attributes {dimension_semantics = [#tpu.dimension_semantics<parallel>], iteration_bounds = array<i64: 1>, scalar_prefetch = 0 : i64, scratch_operands = 0 : i64, tpu.core_type = #tpu.core_type<tc>, window_params = [{transform_indices = @transform_0, window_bounds = array<i64: 8, 256>}, {transform_indices = @transform_1, window_bounds = array<i64: 8, 1>}, {transform_indices = @transform_2, window_bounds = array<i64: 8, 1>}, {transform_indices = @transform_3, window_bounds = array<i64: 8, 256>}]} {
    %c0 = arith.constant 0 : index
    %c0_0 = arith.constant 0 : index
    %0 = vector.load %arg2[%c0, %c0_0] : memref<8x1xf32, #tpu.memory_space<vmem>>, vector<8x1xf32>
    %c0_1 = arith.constant 0 : index
    %c0_2 = arith.constant 0 : index
    %1 = vector.load %arg3[%c0_1, %c0_2] : memref<8x1xf32, #tpu.memory_space<vmem>>, vector<8x1xf32>
    %c0_3 = arith.constant 0 : index
    %c0_4 = arith.constant 0 : index
    %2 = vector.load %arg1[%c0_3, %c0_4] : memref<8x256xf32, #tpu.memory_space<vmem>>, vector<8x256xf32>
    %3 = arith.mulf %2, %2 : vector<8x256xf32>
    %cst = arith.constant dense<0.000000e+00> : vector<8xf32>
    %4 = vector.multi_reduction <add>, %3, %cst [1] : vector<8x256xf32> to vector<8xf32>
    %5 = vector.shape_cast %4 : vector<8xf32> to vector<8x1xf32>
    %6 = math.sqrt %5 : vector<8x1xf32>
    %cst_5 = arith.constant 1.000000e+05 : f32
    %7 = vector.broadcast %cst_5 : f32 to vector<8x1xf32>
    %8 = arith.mulf %6, %7 : vector<8x1xf32>
    %cst_6 = arith.constant 1.000000e+00 : f32
    %9 = vector.broadcast %cst_6 : f32 to vector<8x1xf32>
    %10 = arith.minimumf %8, %9 : vector<8x1xf32>
    %11 = arith.mulf %10, %0 : vector<8x1xf32>
    %cst_7 = arith.constant 1.000000e+00 : f32
    %12 = vector.broadcast %cst_7 : f32 to vector<8x1xf32>
    %13 = arith.addf %11, %12 : vector<8x1xf32>
    %14 = vector.broadcast %13 : vector<8x1xf32> to vector<8x256xf32>
    %15 = arith.mulf %2, %14 : vector<8x256xf32>
    %16 = vector.broadcast %1 : vector<8x1xf32> to vector<8x256xf32>
    %17 = arith.addf %15, %16 : vector<8x256xf32>
    %c0_8 = arith.constant 0 : index
    %c0_9 = arith.constant 0 : index
    %18 = vector.load %arg4[%c0_8, %c0_9] : memref<8x256xf32, #tpu.memory_space<vmem>>, vector<8x256xf32>
    tpu.vector_store %arg4[%c0_8, %c0_9], %17 {strides = array<i32>} : memref<8x256xf32, #tpu.memory_space<vmem>>, vector<8x256xf32>,
    return
  }
  func.func @transform_0(%arg0: i32) -> (i32, i32) {
    %c0_i32 = arith.constant 0 : i32
    %c0_i32_0 = arith.constant 0 : i32
    return %arg0, %c0_i32 : i32, i32
  }
  func.func @transform_1(%arg0: i32) -> (i32, i32) {
    %c0_i32 = arith.constant 0 : i32
    %c0_i32_0 = arith.constant 0 : i32
    return %arg0, %c0_i32 : i32, i32
  }
  func.func @transform_2(%arg0: i32) -> (i32, i32) {
    %c0_i32 = arith.constant 0 : i32
    %c0_i32_0 = arith.constant 0 : i32
    return %arg0, %c0_i32 : i32, i32
  }
  func.func @transform_3(%arg0: i32) -> (i32, i32) {
    %c0_i32 = arith.constant 0 : i32
    %c0_i32_0 = arith.constant 0 : i32
    return %arg0, %c0_i32 : i32, i32
  }
}

</mosaic_0001>

<bundles_post_ra>
// kernel: tpu_custom_call.1
= control target key start
LH: loop header
LB: loop body
LE: loop exit
PB: predicated region body
PF: predicated region fallthrough
CT: control target
= control target key end

     0   :  { %s141_s0 = inlined_call_operand.vmem [shape: f32[8,256], index: 0, kind: input, shape index: {}]   ;;  %s142_s1 = inlined_call_operand.vmem [shape: f32[8,1], index: 1, kind: input, shape index: {}]   ;;  %s143_s2 = inlined_call_operand.vmem [shape: f32[8,1], index: 2, kind: input, shape index: {}]   ;;  %s144_s3 = inlined_call_operand.hbm [shape: f32[8,256], index: 3, kind: output, shape index: {}]  }
   0x1   :  { %v17_v0 = vld [vmem:[%s141_s0] sm:$0xff]  ;;  %v18_v1 = vld [vmem:[%s141_s0 + $0x8] sm:$0xff] }
   0x2   :  { %8 = vsyncpa [#allocation3], 0  ;;  %v19_v2 = vmul.f32 %v17_v0, %v17_v0  ;;  %v20_v3 = vmul.f32 %v18_v1, %v18_v1  ;;  %v95_v5 = vmov 0   ;;  %v16_v6 = vld [vmem:[%s143_s2] sm:$0xff]  ;;  %s96_s2 = smov [#allocation2]  }
   0x3   :  { %67 = vset.pattern.permute.xlu0 %v95_v5  ;;  %68 = vset.pattern.permute.xlu1 %v95_v5  ;;  %v15_v14 = vld [vmem:[%s142_s1] sm:$0xff]  ;;  %s57_s19 = sshll.u32 %s96_s2, 4  ;;  %s58_s19 = int_to_ptr.vmem [resolvable:$true] %s57_s19 }
   0x4   :  { %v21_v4 = vadd.f32 %v20_v3, %v19_v2  ;;  %44 = vperm.xlu1 %68, %v16_v6   ;;  %s71_s20 = scalar_lea.vmem %s58_s19, 256  ;;  %p76_p1 = scmp.lt.s32.totalorder %s58_s19, %s58_s19 }
   0x5   :  { %p72_p0 = scmp.ne.s32.totalorder %s58_s19, %s71_s20  ;;  %p77_p2 = scmp.lt.s32.totalorder %s71_s20, %s71_s20 }
   0x6   :  { %22 = vadd.xlane.f32.xlu0 %v21_v4 }
   0x7   :  { %p78_p3 = por %p77_p2, %p76_p1 }
   0x9   :  { %p79_p4 = pnand %p78_p3, %p72_p0 }
  0x83   :  { %v45_v19 = vpop.permute.xlu1 %44 }
  0x93   :  { %v23_v7 = vpop.xlane.xlu0 %22 }
  0x94   :  { %69 = vrsqrt.f32 %v23_v7  ;;  %vm26_vm0 = vcmp.eq.f32.partialorder %v23_v7, inf  ;;  %v29_v10 = vand.u32 2147483648, %v23_v7  ;;  %vm28_vm1 = vcmp.eq.f32.partialorder %v23_v7, 0.0 }
  0x9e   :  { %v70_v8 = vpop.eup %69 }
  0x9f   :  { %v25_v9 = vmul.f32 %v70_v8, %v23_v7 }
  0xa1   :  { %v27_v11 = vsel %vm26_vm0, %v23_v7, %v25_v9 }
  0xa2   :  { %v30_v12 = vsel %vm28_vm1, %v29_v10, %v27_v11 }
  0xa3   :  { %v31_v13 = vmul.f32 100000.0, %v30_v12 }
  0xa5   :  { %v32_v15 = vmin.f32 %v31_v13, 1.0 }
  0xa7   :  { %v33_v16 = vmul.f32 %v32_v15, %v15_v14 }
  0xa9   :  { %v34_v17 = vadd.f32 1.0, %v33_v16 }
  0xab   :  { %37 = vperm.xlu0 %67, %v34_v17  }
 0x12a   :  { %v38_v18 = vpop.permute.xlu0 %37 }
 0x12b   :  { %v40_v20 = vmul.f32 %v38_v18, %v17_v0  ;;  %v41_v21 = vmul.f32 %v38_v18, %v18_v1 }
 0x12d   :  { %v47_v22 = vadd.f32 %v45_v19, %v40_v20  ;;  %v48_v23 = vadd.f32 %v45_v19, %v41_v21 }
 0x12f   :  { %49 = vst [vmem:[#allocation2] sm:$0xff] %v47_v22  ;;  %50 = vst [vmem:[#allocation2 + $0x8] sm:$0xff] %v48_v23 }
 0x130   :  { %82 = shalt.err (!%p79_p4)
}
 0x131   :  { %s83_s22 = scalar_lea.hbm %s144_s3, 256 }
 0x132   :  { %p84_p5 = scmp.ne.s32.totalorder %s144_s3, %s83_s22  ;;  %p87_p6 = scmp.lt.u32.totalorder %s83_s22, %s144_s3 }
 0x134   :  { %p89_p7 = pnand %p87_p6, %p84_p5 }
 0x136   :  { %92 = shalt.err (!%p89_p7)
}
 0x137   :  { %60 = dma.vmem_to_hbm [thread:$0]  %s58_s19, 256, %s144_s3, [#allocation3]  }
 0x138   :  { %93 = dma.done.wait [#allocation3], 256  }
 0x139   :  { %94 = vsyncadd [#allocation3], 4294967040 }
 0x13a   :  { %64 = vsyncpa [#allocation3], 1 }

</bundles_post_ra>
